<compile_context>
chip_gen: v6e
topology: v6e:2x2x1
jax: 0.10.0
libtpu: 0.0.40
codegen_flags: <defaults>
</compile_context>

<pallas_src>
import jax
import jax.numpy as jnp
import numpy as np
from jax.experimental import pallas as pl
from jax.experimental.pallas import tpu as pltpu


def _round_up(x: int, m: int) -> int:
    return ((x + m - 1) // m) * m


# ----------------------------------------------------------------------------
# Kernel 1: fused MLP forward  (x -> tanh(x@W1+b1) -> tanh(h@W2+b2))
# All operands are padded to lane-dense shapes by the host wrapper; the output
# block is bf16 so writeback traffic is halved (kernel is HBM-bound).
# ----------------------------------------------------------------------------
def mlp_forward_kernel(x_ref, w1_ref, b1_ref, w2_ref, b2_ref, o_ref):
    x = x_ref[...]
    h = jnp.tanh(
        jnp.dot(x, w1_ref[...], preferred_element_type=jnp.float32) + b1_ref[...]
    )
    h = h.astype(w2_ref.dtype)
    y = jnp.tanh(
        jnp.dot(h, w2_ref[...], preferred_element_type=jnp.float32) + b2_ref[...]
    )
    o_ref[...] = y.astype(o_ref.dtype)


def pad_mlp_params(w1, b1, w2, b2, param_dtype=jnp.bfloat16):
    """Pad feature dims to multiples of 128 once; cast weights for the MXU.

    Pass param_dtype=jnp.float32 if callers need tighter agreement with the
    f32 torch module (bf16 gives ~1e-2 absolute error on tanh outputs).
    """
    obs, hid = w1.shape
    act = w2.shape[1]
    obs_p, hid_p, act_p = _round_up(obs, 128), _round_up(hid, 128), _round_up(act, 128)
    w1p = jnp.pad(w1, ((0, obs_p - obs), (0, hid_p - hid))).astype(param_dtype)
    b1p = jnp.pad(b1.reshape(1, -1), ((0, 0), (0, hid_p - hid))).astype(jnp.float32)
    w2p = jnp.pad(w2, ((0, hid_p - hid), (0, act_p - act))).astype(param_dtype)
    b2p = jnp.pad(b2.reshape(1, -1), ((0, 0), (0, act_p - act))).astype(jnp.float32)
    return w1p, b1p, w2p, b2p


def _mlp_forward_padded(xp, w1p, b1p, w2p, b2p, *, block_m):
    """xp: (B_pad, obs_pad) already padded; returns (B_pad, act_pad) bf16."""
    b_p, obs_p = xp.shape
    hid_p = w1p.shape[1]
    act_p = w2p.shape[1]
    return pl.pallas_call(
        mlp_forward_kernel,
        out_shape=jax.ShapeDtypeStruct((b_p, act_p), jnp.bfloat16),
        grid_spec=pltpu.PrefetchScalarGridSpec(
            num_scalar_prefetch=0,
            grid=(b_p // block_m,),
            in_specs=[
                pl.BlockSpec((block_m, obs_p), lambda i: (i, 0)),   # activations: tiled
                pl.BlockSpec((obs_p, hid_p), lambda i: (0, 0)),     # weights: VMEM-resident
                pl.BlockSpec((1, hid_p), lambda i: (0, 0)),
                pl.BlockSpec((hid_p, act_p), lambda i: (0, 0)),
                pl.BlockSpec((1, act_p), lambda i: (0, 0)),
            ],
            out_specs=pl.BlockSpec((block_m, act_p), lambda i: (i, 0)),
        ),
        compiler_params=pltpu.CompilerParams(dimension_semantics=("parallel",)),
    )(xp, w1p, b1p, w2p, b2p)


def _choose_block_m(batch: int, block_m: int) -> int:
    """Batch tile: multiple of 16 (bf16 sublane packing), no over-padding for
    mid-size batches, and >=4 grid steps for big batches (pipelining and v7x
    2-TensorCore sharding of the 'parallel' batch axis)."""
    bm = min(block_m, _round_up(batch, 16))
    if batch >= 4 * 128:
        bm = min(bm, _round_up(-(-batch // 4), 16))
    return max(bm, 16)


def _forward_with_padded(x, padded, obs, act, block_m):
    w1p, b1p, w2p, b2p = padded
    batch = x.shape[0]
    bm = _choose_block_m(batch, block_m)
    b_p = _round_up(batch, bm)
    obs_p = w1p.shape[0]
    xp = jnp.pad(x, ((0, b_p - batch), (0, obs_p - obs))).astype(w1p.dtype)
    out = _mlp_forward_padded(xp, w1p, b1p, w2p, b2p, block_m=bm)
    return out[:batch, :act].astype(jnp.float32)


def mlp_forward(x, w1, b1, w2, b2, *, block_m=512, param_dtype=jnp.bfloat16,
                padded=None):
    obs = w1.shape[0]
    act = w2.shape[1]
    if padded is None:
        padded = pad_mlp_params(w1, b1, w2, b2, param_dtype)
    return _forward_with_padded(x, padded, obs, act, block_m)


# ----------------------------------------------------------------------------
# Kernel 2: centered power sums over the flattened parameter vector.
# Centering (x - mu) is fused into the kernel (mu read from SMEM), so the only
# HBM traffic is one streaming read of the pre-padded (split, rows, 128) f32
# buffer.  Zero padding contributes (-mu)^k per pad element, corrected exactly
# on the host.  Leading 'parallel' axis splits rows across TensorCores (v7x);
# the per-core (1,8,128) output block is VMEM-resident across the reduction
# axis (pl.when init at step 0, "arbitrary").
# ----------------------------------------------------------------------------
def centered_moment_kernel(mu_ref, x_ref, o_ref):
    @pl.when(pl.program_id(1) == 0)
    def _():
        o_ref[...] = jnp.zeros_like(o_ref)

    x = x_ref[0] - mu_ref[0]
    x2 = x * x
    s1 = jnp.sum(x, axis=0, keepdims=True)
    s2 = jnp.sum(x2, axis=0, keepdims=True)
    s3 = jnp.sum(x2 * x, axis=0, keepdims=True)
    s4 = jnp.sum(x2 * x2, axis=0, keepdims=True)
    pad = jnp.zeros((4, x.shape[1]), jnp.float32)
    o_ref[...] += jnp.concatenate([s1, s2, s3, s4, pad], axis=0)[None]


def _moment_layout(n: int, *, block_rows: int = 8192, split: int = 2):
    """Pick (split, rows_per_split, block_rows) minimizing tail padding."""
    rows_min = _round_up(max(-(-n // 128), 1), 8)
    if split > 1 and rows_min < 16 * split:
        split = 1
    per = -(-rows_min // split)
    br = min(block_rows, _round_up(per, 8))
    per = _round_up(max(per, 8), br)
    return split, per, br


def pad_for_moments(flat, layout):
    """Pad/reshape the flat f32 vector once into the kernel's (split, per, 128)
    layout (do this at init; the kernel then only streams it)."""
    split, per, _ = layout
    total = split * per * 128
    flat = jnp.asarray(flat, jnp.float32).reshape(-1)
    return jnp.pad(flat, (0, total - flat.shape[0])).reshape(split, per, 128)


def _centered_power_sums_pallas(padded, mu, n):
    split, per, lanes = padded.shape
    # block_rows was baked into `per` by _moment_layout; recover the step count.
    # (per is a multiple of the chosen block_rows; use the largest divisor <= 8192.)
    br = per
    for cand in (8192, 4096, 2048, 1024, 512, 256, 128, 64, 32, 16, 8):
        if per % cand == 0:
            br = cand if per > 8192 else per
            break
    if per <= 8192:
        br = per
    mu_arr = jnp.asarray(mu, jnp.float32).reshape(1)
    partial = pl.pallas_call(
        centered_moment_kernel,
        out_shape=jax.ShapeDtypeStruct((split, 8, 128), jnp.float32),
        grid_spec=pltpu.PrefetchScalarGridSpec(
            num_scalar_prefetch=0,
            grid=(split, per // br),
            in_specs=[
                pl.BlockSpec(memory_space=pltpu.MemorySpace.SMEM),   # mu scalar
                pl.BlockSpec((1, br, 128), lambda c, r: (c, r, 0)),
            ],
            out_specs=pl.BlockSpec((1, 8, 128), lambda c, r: (c, 0, 0)),
        ),
        compiler_params=pltpu.CompilerParams(
            dimension_semantics=("parallel", "arbitrary")),
    )(mu_arr, padded)
    sums = jnp.sum(partial, axis=(0, 2))          # finish lane + core reduction
    # exact correction for zero-padded elements (each contributes (-mu)^k)
    n_pad = jnp.float32(split * per * 128 - n)
    s1 = sums[0] + n_pad * mu
    s2 = sums[1] - n_pad * mu * mu
    s3 = sums[2] + n_pad * mu * mu * mu
    s4 = sums[3] - n_pad * mu * mu * mu * mu
    return s1, s2, s3, s4


def param_moments(flat_params, *, use_pallas=None, block_rows=8192, split=2,
                  prepadded=None, layout=None):
    """mean/std/skew/kurtosis (scipy bias=True, Fisher) of a flat param vector."""
    flat = jnp.asarray(flat_params, jnp.float32).reshape(-1)
    n = flat.shape[0]
    nf = jnp.float32(n)
    mu = jnp.sum(flat) / nf               # pass 1: mean (single HBM read)
    if use_pallas is None:
        use_pallas = n >= (1 << 16)       # kernel only pays off for big vectors
    if use_pallas:
        if prepadded is None:
            layout = _moment_layout(n, block_rows=block_rows, split=split)
            prepadded = pad_for_moments(flat, layout)
        s1, s2, s3, s4 = _centered_power_sums_pallas(prepadded, mu, n)
    else:
        xc = flat - mu
        x2 = xc * xc
        s1, s2 = jnp.sum(xc), jnp.sum(x2)
        s3, s4 = jnp.sum(x2 * xc), jnp.sum(x2 * x2)
    # m1 is residual roundoff (~0); higher recentering terms are negligible.
    m1 = s1 / nf
    m2 = jnp.maximum(s2 / nf - m1 * m1, 0.0)
    m3 = s3 / nf
    m4 = s4 / nf
    mean = mu + m1
    std = jnp.sqrt(m2)
    safe_m2 = jnp.where(m2 > 0, m2, 1.0)
    skew = jnp.where(m2 > 0, m3 / safe_m2 ** 1.5, 0.0)
    kurt = jnp.where(m2 > 0, m4 / (safe_m2 * safe_m2) - 3.0, -3.0)
    return mean, std, skew, kurt


# ----------------------------------------------------------------------------
# Policy wrapper (mirrors the torch class; forward delegates to the MLP kernel)
# ----------------------------------------------------------------------------
class PolicyPallas:
    def __init__(self, params, lr: float, *, block_m=512,
                 param_dtype=jnp.bfloat16, moments_use_pallas=None,
                 moment_block_rows=8192):
        self.lr = lr
        self._params = params  # dict: w1, b1, w2, b2 (unpadded, f32)
        self._block_m = block_m
        self._param_dtype = param_dtype
        self._obs = params["w1"].shape[0]
        self._act = params["w2"].shape[1]
        # pad + cast once at init; forwards reuse the padded weights
        self._padded = pad_mlp_params(params["w1"], params["b1"],
                                      params["w2"], params["b2"], param_dtype)
        # flat params (same role as torch.cat of flattened state_dict values)
        self.flat_params = jnp.concatenate(
            [jnp.asarray(p, jnp.float32).reshape(-1) for p in params.values()])
        self.n_params = int(self.flat_params.shape[0])
        self.best = self.flat_params
        # pre-pad to the moment kernel's (split, rows, 128) layout once
        if moments_use_pallas is None:
            moments_use_pallas = self.n_params >= (1 << 16)
        if moments_use_pallas:
            self._moment_layout = _moment_layout(self.n_params,
                                                 block_rows=moment_block_rows)
            self._moment_padded = pad_for_moments(self.flat_params,
                                                  self._moment_layout)
        else:
            self._moment_layout = None
            self._moment_padded = None
        self.mu, self.std, self.skew, self.kurt = param_moments(
            self.flat_params, use_pallas=moments_use_pallas,
            prepadded=self._moment_padded, layout=self._moment_layout)
        self.mode = 0
        # TODO(synk): pheno() / set_nn_params() / update_best() histogram and
        # cholesky mixing are host-side ES bookkeeping (numpy), not kernel work.

    def __len__(self):
        return self.n_params

    def forward(self, inp):
        # Note: the torch Policy.forward discards the inner module's output;
        # we return it here so the kernel result can be inspected.
        return _forward_with_padded(inp, self._padded, self._obs, self._act,
                                    self._block_m)


# ----------------------------------------------------------------------------
if __name__ == "__main__":
    key = jax.random.PRNGKey(0)
    B, OBS, HID, ACT = 8, 32, 32, 8

    k1, k2, k3, k4, kx, kb, kp = jax.random.split(key, 7)
    params = {
        "w1": jax.random.normal(k1, (OBS, HID), jnp.float32) * 0.1,
        "b1": jax.random.normal(k2, (1, HID), jnp.float32) * 0.1,
        "w2": jax.random.normal(k3, (HID, ACT), jnp.float32) * 0.1,
        "b2": jax.random.normal(k4, (1, ACT), jnp.float32) * 0.1,
    }
    x = jax.random.normal(kx, (B, OBS), jnp.float32)

    # force the Pallas moment path here so both kernels are exercised
    policy = PolicyPallas(params, lr=0.02, moments_use_pallas=True)
    out = jax.block_until_ready(policy.forward(x))

    # f32 reference for the (bf16-weight, bf16-output) fused MLP kernel
    h_ref = jnp.tanh(x @ params["w1"] + params["b1"])
    y_ref = jnp.tanh(h_ref @ params["w2"] + params["b2"])
    np.testing.assert_allclose(np.asarray(out), np.asarray(y_ref), atol=3e-2, rtol=0)

    # larger batch exercises the multi-step "parallel" grid over batch blocks
    xb = jax.random.normal(kb, (512, OBS), jnp.float32)
    outb = jax.block_until_ready(policy.forward(xb))
    hb_ref = jnp.tanh(xb @ params["w1"] + params["b1"])
    yb_ref = jnp.tanh(hb_ref @ params["w2"] + params["b2"])
    np.testing.assert_allclose(np.asarray(outb), np.asarray(yb_ref), atol=3e-2, rtol=0)

    # moment checks: tiny policy vector (forced kernel path) ...
    fp = np.asarray(policy.flat_params, np.float64)
    np.testing.assert_allclose(float(policy.mu), fp.mean(), atol=1e-5)
    np.testing.assert_allclose(float(policy.std), fp.std(), atol=1e-5)

    # ... and a realistically sized parameter vector (2-core x multi-step grid)
    big = jax.random.normal(kp, (1_500_000,), jnp.float32) * 0.3 + 0.05
    mu_b, sd_b, sk_b, ku_b = jax.block_until_ready(
        param_moments(big, use_pallas=True, block_rows=8192))
    b64 = np.asarray(big, np.float64)
    c = b64 - b64.mean()
    m2 = np.mean(c ** 2)
    m3 = np.mean(c ** 3)
    m4 = np.mean(c ** 4)
    np.testing.assert_allclose(float(mu_b), b64.mean(), atol=1e-4)
    np.testing.assert_allclose(float(sd_b), np.sqrt(m2), rtol=1e-3)
    np.testing.assert_allclose(float(sk_b), m3 / m2 ** 1.5, atol=2e-2)
    np.testing.assert_allclose(float(ku_b), m4 / m2 ** 2 - 3.0, atol=2e-2)

    print("KERNEL_OK")
</pallas_src>

<mosaic_0001>
module attributes {stable_mosaic.version = 11 : i64} {
  func.func @centered_moment_kernel(%arg0: i32, %arg1: i32, %arg2: memref<1xf32, #tpu.memory_space<smem>>, %arg3: memref<1x16x128xf32, #tpu.memory_space<vmem>>, %arg4: memref<1x8x128xf32, #tpu.memory_space<vmem>>) attributes {dimension_semantics = [#tpu.dimension_semantics<parallel>, #tpu.dimension_semantics<arbitrary>], iteration_bounds = array<i64: 1, 1>, scalar_prefetch = 0 : i64, scratch_operands = 0 : i64, tpu.core_type = #tpu.core_type<tc>, window_params = [{transform_indices = @transform_0, window_bounds = array<i64: 1>}, {transform_indices = @transform_1, window_bounds = array<i64: 1, 16, 128>}, {transform_indices = @transform_2, window_bounds = array<i64: 1, 8, 128>}]} {
    %c0_i32 = arith.constant 0 : i32
    %0 = arith.cmpi eq, %arg1, %c0_i32 : i32
    %1 = arith.extui %0 : i1 to i32
    %c0_i32_0 = arith.constant 0 : i32
    %2 = arith.cmpi ne, %1, %c0_i32_0 : i32
    scf.if %2 {
      %cst_14 = arith.constant 0.000000e+00 : f32
      %25 = vector.broadcast %cst_14 : f32 to vector<1x8x128xf32>
      %c0_15 = arith.constant 0 : index
      %c0_16 = arith.constant 0 : index
      %c0_17 = arith.constant 0 : index
      %26 = vector.load %arg4[%c0_15, %c0_16, %c0_17] : memref<1x8x128xf32, #tpu.memory_space<vmem>>, vector<1x8x128xf32>
      tpu.vector_store %arg4[%c0_15, %c0_16, %c0_17], %25 {strides = array<i32>} : memref<1x8x128xf32, #tpu.memory_space<vmem>>, vector<1x8x128xf32>,
    } else {
    }
    %c0 = arith.constant 0 : index
    %c0_1 = arith.constant 0 : index
    %c0_2 = arith.constant 0 : index
    %3 = vector.load %arg3[%c0, %c0_1, %c0_2] : memref<1x16x128xf32, #tpu.memory_space<vmem>>, vector<1x16x128xf32>
    %4 = vector.shape_cast %3 : vector<1x16x128xf32> to vector<16x128xf32>
    %c0_3 = arith.constant 0 : index
    %5 = memref.load %arg2[%c0_3] : memref<1xf32, #tpu.memory_space<smem>>
    %6 = vector.broadcast %5 : f32 to vector<16x128xf32>
    %7 = arith.subf %4, %6 : vector<16x128xf32>
    %8 = arith.mulf %7, %7 : vector<16x128xf32>
    %cst = arith.constant dense<0.000000e+00> : vector<128xf32>
    %9 = vector.multi_reduction <add>, %7, %cst [0] : vector<16x128xf32> to vector<128xf32>
    %10 = vector.shape_cast %9 : vector<128xf32> to vector<1x128xf32>
    %cst_4 = arith.constant dense<0.000000e+00> : vector<128xf32>
    %11 = vector.multi_reduction <add>, %8, %cst_4 [0] : vector<16x128xf32> to vector<128xf32>
    %12 = vector.shape_cast %11 : vector<128xf32> to vector<1x128xf32>
    %13 = arith.mulf %8, %7 : vector<16x128xf32>
    %cst_5 = arith.constant dense<0.000000e+00> : vector<128xf32>
    %14 = vector.multi_reduction <add>, %13, %cst_5 [0] : vector<16x128xf32> to vector<128xf32>
    %15 = vector.shape_cast %14 : vector<128xf32> to vector<1x128xf32>
    %16 = arith.mulf %8, %8 : vector<16x128xf32>
    %cst_6 = arith.constant dense<0.000000e+00> : vector<128xf32>
    %17 = vector.multi_reduction <add>, %16, %cst_6 [0] : vector<16x128xf32> to vector<128xf32>
    %18 = vector.shape_cast %17 : vector<128xf32> to vector<1x128xf32>
    %cst_7 = arith.constant 0.000000e+00 : f32
    %19 = vector.broadcast %cst_7 : f32 to vector<4x128xf32>
    %c0_8 = arith.constant 0 : index
    %c0_9 = arith.constant 0 : index
    %c0_10 = arith.constant 0 : index
    %20 = vector.load %arg4[%c0_8, %c0_9, %c0_10] : memref<1x8x128xf32, #tpu.memory_space<vmem>>, vector<1x8x128xf32>
    %21 = tpu.concatenate %10, %12, %15, %18, %19 in 0 : vector<1x128xf32>, vector<1x128xf32>, vector<1x128xf32>, vector<1x128xf32>, vector<4x128xf32> -> vector<8x128xf32>
    %22 = vector.shape_cast %21 : vector<8x128xf32> to vector<1x8x128xf32>
    %23 = arith.addf %20, %22 : vector<1x8x128xf32>
    %c0_11 = arith.constant 0 : index
    %c0_12 = arith.constant 0 : index
    %c0_13 = arith.constant 0 : index
    %24 = vector.load %arg4[%c0_11, %c0_12, %c0_13] : memref<1x8x128xf32, #tpu.memory_space<vmem>>, vector<1x8x128xf32>
    tpu.vector_store %arg4[%c0_11, %c0_12, %c0_13], %23 {strides = array<i32>} : memref<1x8x128xf32, #tpu.memory_space<vmem>>, vector<1x8x128xf32>,
    return
  }
  func.func @transform_0(%arg0: i32, %arg1: i32) -> i32 {
    %c0_i32 = arith.constant 0 : i32
    %c0_i32_0 = arith.constant 0 : i32
    return %c0_i32 : i32
  }
  func.func @transform_1(%arg0: i32, %arg1: i32) -> (i32, i32, i32) {
    %c0_i32 = arith.constant 0 : i32
    %c0_i32_0 = arith.constant 0 : i32
    return %arg0, %arg1, %c0_i32 : i32, i32, i32
  }
  func.func @transform_2(%arg0: i32, %arg1: i32) -> (i32, i32, i32) {
    %c0_i32 = arith.constant 0 : i32
    %c0_i32_0 = arith.constant 0 : i32
    %c0_i32_1 = arith.constant 0 : i32
    return %arg0, %c0_i32, %c0_i32_0 : i32, i32, i32
  }
}

</mosaic_0001>

<bundles_post_ra>
// kernel: tpu_custom_call.1
= control target key start
LH: loop header
LB: loop body
LE: loop exit
PB: predicated region body
PF: predicated region fallthrough
CT: control target
= control target key end

     0   :  { %8 = vsyncpa [#allocation4], 0  ;;  %s175_s0 = inlined_call_operand.<no memory space> [shape: f32[1], index: 0, kind: input, shape index: {}]   ;;  %s176_s1 = inlined_call_operand.hbm [shape: f32[1,16,128], index: 1, kind: input, shape index: {}]   ;;  %s177_s2 = inlined_call_operand.hbm [shape: f32[1,8,128], index: 2, kind: output, shape index: {}]  }
   0x1   :  { %9 = vsyncpa [#allocation5], 0  ;;  %s147_s9 = smov [#allocation3]  }
   0x2   :  { %s17_s10 = sshll.u32 %s147_s9, 4  ;;  %s18_s10 = int_to_ptr.vmem [resolvable:$true] %s17_s10 }
   0x3   :  { %s111_s11 = scalar_lea.vmem %s18_s10, 256  ;;  %p116_p1 = scmp.lt.s32.totalorder %s18_s10, %s18_s10 }
   0x4   :  { %p112_p0 = scmp.ne.s32.totalorder %s18_s10, %s111_s11  ;;  %p117_p2 = scmp.lt.s32.totalorder %s111_s11, %s111_s11 }
   0x6   :  { %p118_p3 = por %p117_p2, %p116_p1 }
   0x8   :  { %p119_p4 = pnand %p118_p3, %p112_p0 }
   0xa   :  { %122 = shalt.err (!%p119_p4)
}
   0xb   :  { %s148_s12 = smov 128   ;;  %s149_s13 = smov 8  }
   0xc   :  { %23 = dma.hbm_to_vmem [thread:$0]  %s176_s1, 256, %s18_s10, [#allocation4], %s148_s12, %s148_s12, %s149_s13  }
   0xd   :  { %143 = dma.done.wait [#allocation4], 256  }
   0xe   :  { %144 = vsyncadd [#allocation4], 4294967040  ;;  %v35_v0 = vstv %s175_s0  ;;  %v32_v1 = vld [vmem:[#allocation3] sm:$0xff]  ;;  %v33_v2 = vld [vmem:[#allocation3 + $0x8] sm:$0xff]  ;;  %vm73_vm0 = vcmask 1040384   ;;  %vm75_vm1 = vcmask 1041408  }
   0xf   :  { %v36_v3 = vsub.f32 %v32_v1, %v35_v0  ;;  %v37_v4 = vsub.f32 %v33_v2, %v35_v0  ;;  %vm77_vm2 = vcmask 1042432   ;;  %vm79_vm3 = vcmask 1043456   ;;  %s150_s0 = smov [#allocation6]  }
  0x10   :  { %s89_s1 = sshll.u32 %s150_s0, 4  ;;  %s90_s1 = int_to_ptr.vmem [resolvable:$true] %s89_s1 }
  0x11   :  { %v38_v5 = vmul.f32 %v36_v3, %v36_v3  ;;  %v39_v6 = vmul.f32 %v37_v4, %v37_v4  ;;  %v40_v7 = vadd.f32 %v37_v4, %v36_v3  ;;  %s123_s18 = scalar_lea.vmem %s90_s1, 128  ;;  %p128_p6 = scmp.lt.s32.totalorder %s90_s1, %s90_s1 }
  0x12   :  { %p124_p5 = scmp.ne.s32.totalorder %s90_s1, %s123_s18  ;;  %p129_p7 = scmp.lt.s32.totalorder %s123_s18, %s123_s18 }
  0x13   :  { %v41_v8 = vrot.slane %v40_v7, 4  ;;  %v47_v9 = vadd.f32 %v39_v6, %v38_v5  ;;  %v54_v10 = vmul.f32 %v38_v5, %v36_v3  ;;  %v55_v11 = vmul.f32 %v39_v6, %v37_v4 }
  0x14   :  { %v63_v12 = vmul.f32 %v38_v5, %v38_v5  ;;  %v64_v13 = vmul.f32 %v39_v6, %v39_v6  ;;  %p130_p8 = por %p129_p7, %p128_p6 }
  0x15   :  { %v42_v14 = vadd.f32 %v41_v8, %v40_v7  ;;  %v48_v15 = vrot.slane %v47_v9, 4  ;;  %v56_v16 = vadd.f32 %v55_v11, %v54_v10 }
  0x16   :  { %v65_v17 = vadd.f32 %v64_v13, %v63_v12  ;;  %p131_p9 = pnand %p130_p8, %p124_p5 }
  0x17   :  { %v43_v18 = vrot.slane %v42_v14, 2  ;;  %v49_v19 = vadd.f32 %v48_v15, %v47_v9  ;;  %v57_v20 = vrot.slane %v56_v16, 4 }
  0x18   :  { %v66_v21 = vrot.slane %v65_v17, 4 }
  0x19   :  { %v44_v22 = vadd.f32 %v43_v18, %v42_v14  ;;  %v50_v23 = vrot.slane %v49_v19, 2  ;;  %v58_v24 = vadd.f32 %v57_v20, %v56_v16 }
  0x1a   :  { %v67_v25 = vadd.f32 %v66_v21, %v65_v17 }
  0x1b   :  { %v45_v26 = vrot.slane %v44_v22, 1  ;;  %v51_v27 = vadd.f32 %v50_v23, %v49_v19  ;;  %v59_v28 = vrot.slane %v58_v24, 2 }
  0x1c   :  { %v68_v29 = vrot.slane %v67_v25, 2 }
  0x1d   :  { %v46_v30 = vadd.f32 %v45_v26, %v44_v22  ;;  %v52_v31 = vrot.slane %v51_v27, 1  ;;  %v60_v32 = vadd.f32 %v59_v28, %v58_v24 }
  0x1e   :  { %v69_v33 = vadd.f32 %v68_v29, %v67_v25 }
  0x1f   :  { %v53_v34 = vadd.f32 %v52_v31, %v51_v27  ;;  %v61_v35 = vrot.slane %v60_v32, 1 }
  0x20   :  { %v70_v36 = vrot.slane %v69_v33, 1 }
  0x21   :  { %v62_v37 = vadd.f32 %v61_v35, %v60_v32  ;;  %v74_v38 = vsel %vm73_vm0, %v46_v30, %v53_v34 }
  0x22   :  { %v71_v39 = vadd.f32 %v70_v36, %v69_v33 }
  0x23   :  { %v76_v40 = vsel %vm75_vm1, %v74_v38, %v62_v37 }
  0x24   :  { %v78_v41 = vsel %vm77_vm2, %v76_v40, %v71_v39 }
  0x25   :  { %v80_v42 = vsel %vm79_vm3, %v78_v41, 0.0 }
  0x26   :  { %82 = vst [vmem:[#allocation6] sm:$0xff] %v80_v42 }
  0x27   :  { %134 = shalt.err (!%p131_p9)
}
  0x28   :  { %92 = dma.vmem_to_hbm [thread:$0]  %s90_s1, 128, %s177_s2, [#allocation5]  }
  0x29   :  { %145 = dma.done.wait [#allocation5], 128  }
  0x2a   :  { %146 = vsyncadd [#allocation5], 4294967168 }
  0x2b   :  { %96 = vsyncpa [#allocation4], 1 }
  0x2c   :  { %97 = vsyncpa [#allocation5], 1 }

</bundles_post_ra>
